<compile_context>
chip_gen: v6e
topology: v6e:2x2x1
jax: 0.10.0
libtpu: 0.0.40
codegen_flags: <defaults>
</compile_context>

<pallas_src>
import numpy as np
import jax
import jax.numpy as jnp
from jax import lax
from jax.experimental import pallas as pl
from jax.experimental.pallas import tpu as pltpu

K = 3  # conv kernel size / wavelet filter size
# Tap offsets (dy, dx) in row-major (ky*K + kx) order -> matches a 3x3
# cross-correlation with padding=1 (PyTorch conv2d semantics).
TAPS = tuple((ky - 1, kx - 1) for ky in range(K) for kx in range(K))


def _get_morlet_filter(num_orientations, kernel_size, sigma=2.0):
    """Direct port of WaveletLayerDL._get_morlet_filter (deterministic, numpy)."""
    f0 = 2.0 / (1.0 + np.sqrt(2.0))
    w_real = np.zeros((num_orientations, kernel_size, kernel_size))
    w_imag = np.zeros((num_orientations, kernel_size, kernel_size))
    for i in range(num_orientations):
        theta = i * np.pi / num_orientations
        xs, ys = np.meshgrid(
            np.arange(-kernel_size // 2 + 1, kernel_size // 2 + 1),
            np.arange(-kernel_size // 2 + 1, kernel_size // 2 + 1))
        x_theta = xs * np.cos(theta) + ys * np.sin(theta)
        y_theta = -xs * np.sin(theta) + ys * np.cos(theta)
        env = np.exp(-0.5 * (x_theta ** 2 + y_theta ** 2) / sigma ** 2)
        w_real[i] = env * np.cos(2 * np.pi * f0 * x_theta)
        w_imag[i] = env * np.sin(2 * np.pi * f0 * x_theta)
    return np.stack([w_real, w_imag], axis=1).astype(np.float32)  # (O, 2, k, k)


def _make_kernel(B, C, H, W, fr, fi):
    """Single-invocation kernel: whole batch packed as (B*C, H*W)."""
    HW = H * W
    BC = B * C
    n_taps = len(TAPS)

    def kernel(x_ref, w_ref, bias_ref, out_ref):
        # x_ref   : (B*C, HW)       VMEM  whole batch, (batch,channel) on sublanes
        # w_ref   : (Mpad, 9*B*C)   VMEM  block-diagonal stage-1 weight matrix
        # bias_ref: (3,)            SMEM  scalars [b_psi0, b_psi1, b_phi]
        # out_ref : (2*B, HW)       VMEM  rows [psi_b0..psi_b(B-1), phi_b0..]
        xs = x_ref[...]  # (BC, HW) f32

        # ---- per-tap boundary-validity masks, generated in-kernel (no HBM) ----
        pos = lax.broadcasted_iota(jnp.int32, (1, HW), 1)
        if (W & (W - 1)) == 0:                      # power-of-two fast path
            row = pos >> (W.bit_length() - 1)
            col = pos & (W - 1)
        else:                                        # generic (unused in demo)
            row = pos // W
            col = pos % W
        valids = []
        for (dy, dx) in TAPS:
            conds = []
            if dy < 0:
                conds.append(row >= -dy)
            if dy > 0:
                conds.append(row < H - dy)
            if dx < 0:
                conds.append(col >= -dx)
            if dx > 0:
                conds.append(col < W - dx)
            v = None
            for cnd in conds:
                v = cnd if v is None else (v & cnd)
            valids.append(v)                        # None for the centre tap

        def shift_mask(val, t):
            # shifted[p] = val[p + off_t]; out-of-image reads forced to exact 0.
            dy, dx = TAPS[t]
            off = dy * W + dx
            r = val if off == 0 else pltpu.roll(val, shift=(-off) % HW, axis=1)
            return r if valids[t] is None else jnp.where(valids[t], r, 0.0)

        # ---- stage 1: conv_psi (2 ch) + conv_phi (1 ch) as ONE MXU matmul ----
        # im2col slab rows ordered (t, b, c); lanes = flattened spatial.
        slab = jnp.concatenate([shift_mask(xs, t) for t in range(n_taps)],
                               axis=0)                               # (9*BC, HW)
        s1 = jnp.dot(w_ref[...], slab,
                     preferred_element_type=jnp.float32,
                     precision=lax.Precision.HIGHEST)                # (Mpad, HW)

        psi0 = s1[0 * B:1 * B, :] + bias_ref[0]                      # (B, HW)
        psi1 = s1[1 * B:2 * B, :] + bias_ref[1]                      # (B, HW)
        phi = s1[2 * B:3 * B, :] + bias_ref[2]                       # (B, HW)

        # ---- stage 2: psi_real - psi_imag (3x3 wavelet filter, pad=1) --------
        # Filter taps are Python float immediates; combine BEFORE the shift
        # (linearity), then one roll + one select per tap.  Zero taps skipped.
        acc = None
        for t in range(n_taps):
            c_re = fr[t]
            c_im = -fi[t]
            if c_re == 0.0 and c_im == 0.0:
                continue
            if c_im == 0.0:
                combo = psi0 if c_re == 1.0 else psi0 * c_re
            elif c_re == 0.0:
                combo = psi1 * c_im
            else:
                combo = psi0 * c_re + psi1 * c_im
            term = shift_mask(combo, t)
            acc = term if acc is None else acc + term
        psi_f = jnp.zeros((B, HW), jnp.float32) if acc is None else acc

        # Single lane-dense store; psi duplication and the _apply_phi_filter
        # identity (mean over a single channel) are handled by the wrapper.
        out_ref[...] = jnp.concatenate([psi_f, phi], axis=0)         # (2B, HW)

    return kernel


def make_wavelet_layer_dl(psi_filter_np):
    """Build a jitted forward closed over the (deterministic) Morlet filter."""
    psi_filter_np = np.asarray(psi_filter_np, np.float32)
    assert psi_filter_np.shape[0] == 1, \
        "reference forward is only shape-consistent for num_orientations == 1"
    assert psi_filter_np.shape[-2:] == (K, K)
    fr = [float(v) for v in psi_filter_np[0, 0].reshape(-1)]
    fi = [float(v) for v in psi_filter_np[0, 1].reshape(-1)]

    @jax.jit
    def forward(x, w_psi, b_psi, w_phi, b_phi):
        x = x.astype(jnp.float32)
        B, C, H, W = x.shape
        HW = H * W
        BC = B * C

        # Free, contiguous reshape: (batch, channel) onto sublanes, spatial onto
        # lanes -> (8, 256) for the demo shape, fully dense vregs.
        x_packed = x.reshape(BC, HW)

        # Stage-1 weights as one lane-dense block-diagonal matrix so the whole
        # batch needs a single MXU dot:
        #   row m = oc*B + b ; col k = t*(B*C) + b'*C + c ; zero unless b == b'.
        w_all = jnp.concatenate([w_psi.astype(jnp.float32),
                                 w_phi.astype(jnp.float32)], axis=0)   # (3,C,K,K)
        w1 = jnp.transpose(w_all.reshape(3, C, K * K), (0, 2, 1))      # (3,9,C)
        eye_b = jnp.eye(B, dtype=jnp.float32)
        w_blk = jnp.einsum('otc,bp->obtpc', w1, eye_b).reshape(3 * B, K * K * BC)
        m_pad = ((3 * B + 7) // 8) * 8                                 # sublane-align rows
        w_big = jnp.zeros((m_pad, K * K * BC), jnp.float32).at[:3 * B].set(w_blk)

        bias = jnp.concatenate([b_psi.astype(jnp.float32),
                                b_phi.astype(jnp.float32)])            # (3,) -> SMEM

        kernel = _make_kernel(B, C, H, W, fr, fi)
        out_flat = pl.pallas_call(
            kernel,
            out_shape=jax.ShapeDtypeStruct((2 * B, HW), jnp.float32),
            in_specs=[
                pl.BlockSpec(memory_space=pltpu.MemorySpace.VMEM),   # x_packed
                pl.BlockSpec(memory_space=pltpu.MemorySpace.VMEM),   # w_big
                pl.BlockSpec(memory_space=pltpu.MemorySpace.SMEM),   # bias scalars
            ],
            out_specs=pl.BlockSpec(memory_space=pltpu.MemorySpace.VMEM),
        )(x_packed, w_big, bias)

        psi = out_flat[:B].reshape(B, 1, H, W)
        phi = out_flat[B:].reshape(B, 1, H, W)
        # Reference output channels are [psi, psi, phi]: both conv_psi output
        # channels see identical tiled filters, so psi is simply duplicated.
        return jnp.concatenate([psi, psi, phi], axis=1)

    return forward


def reference_forward(x, w_psi, b_psi, w_phi, b_phi, psi_filter):
    """Pure-JAX mirror of the PyTorch forward (for verification)."""
    def conv(inp, w, b, pad):
        out = lax.conv_general_dilated(
            inp, w, window_strides=(1, 1), padding=[(pad, pad), (pad, pad)],
            dimension_numbers=("NCHW", "OIHW", "NCHW"),
            precision=lax.Precision.HIGHEST)
        if b is not None:
            out = out + b[None, :, None, None]
        return out

    psi_out = conv(x, w_psi, b_psi, 1)   # (B, 2*O, H, W)
    phi_out = conv(x, w_phi, b_phi, 1)   # (B, 1, H, W)

    num_orientations = psi_filter.shape[0]
    num_channels = psi_out.shape[1]
    k = psi_filter.shape[-1]
    psi_list = []
    for i in range(num_orientations):
        w = jnp.tile(psi_filter[i][None], (num_channels, 1, 1, 1))  # (2O, 2, k, k)
        psi_real = conv(psi_out[:, :num_channels // 2], w[:, :1], None, k // 2)
        psi_imag = conv(psi_out[:, num_channels // 2:], w[:, 1:], None, k // 2)
        psi_list.append(psi_real - psi_imag)
    psi_f = jnp.concatenate(psi_list, axis=1)
    phi_f = jnp.mean(phi_out, axis=1, keepdims=True)
    return jnp.concatenate([psi_f, phi_f], axis=1)


if __name__ == "__main__":
    B, C, H, W = 2, 4, 16, 16
    num_orientations = 1          # only shape-consistent config (see header note)
    sigma = 2.0                   # wavelet_params = {'sigma': 2.0}

    key = jax.random.PRNGKey(0)
    k1, k2, k3, k4, k5 = jax.random.split(key, 5)

    # nn.Conv2d-style deterministic init (uniform(-1/sqrt(fan_in), 1/sqrt(fan_in)))
    fan_in = C * K * K
    bound = 1.0 / np.sqrt(fan_in)
    w_psi = jax.random.uniform(k1, (2 * num_orientations, C, K, K), jnp.float32, -bound, bound)
    b_psi = jax.random.uniform(k2, (2 * num_orientations,), jnp.float32, -bound, bound)
    w_phi = jax.random.uniform(k3, (1, C, K, K), jnp.float32, -bound, bound)
    b_phi = jax.random.uniform(k4, (1,), jnp.float32, -bound, bound)
    psi_filter_np = _get_morlet_filter(num_orientations, K, sigma=sigma)

    x = jax.random.normal(k5, (B, C, H, W), jnp.float32)

    forward = make_wavelet_layer_dl(psi_filter_np)
    out = jax.block_until_ready(forward(x, w_psi, b_psi, w_phi, b_phi))
    ref = jax.block_until_ready(
        reference_forward(x, w_psi, b_psi, w_phi, b_phi, jnp.asarray(psi_filter_np)))

    assert out.shape == (B, 2 * num_orientations + 1, H, W), out.shape
    max_err = float(jnp.max(jnp.abs(out - ref)))
    assert jnp.allclose(out, ref, atol=2e-3, rtol=2e-3), max_err
    print("KERNEL_OK")
</pallas_src>

<mosaic_0001>
module attributes {stable_mosaic.version = 11 : i64} {
  func.func @kernel(%arg0: memref<8x256xf32, #tpu.memory_space<vmem>>, %arg1: memref<8x72xf32, #tpu.memory_space<vmem>>, %arg2: memref<3xf32, #tpu.memory_space<smem>>, %arg3: memref<4x256xf32, #tpu.memory_space<vmem>>) attributes {dimension_semantics = [], scalar_prefetch = 0 : i64, scratch_operands = 0 : i64, tpu.core_type = #tpu.core_type<tc>} {
    %c0 = arith.constant 0 : index
    %c0_0 = arith.constant 0 : index
    %0 = vector.load %arg0[%c0, %c0_0] : memref<8x256xf32, #tpu.memory_space<vmem>>, vector<8x256xf32>
    %1 = tpu.iota {dimensions = array<i32: 1>} : vector<1x256xi32>
    %c4_i32 = arith.constant 4 : i32
    %2 = vector.broadcast %c4_i32 : i32 to vector<1x256xi32>
    %3 = arith.shrsi %1, %2 : vector<1x256xi32>
    %c15_i32 = arith.constant 15 : i32
    %4 = vector.broadcast %c15_i32 : i32 to vector<1x256xi32>
    %5 = arith.andi %1, %4 : vector<1x256xi32>
    %c1_i32 = arith.constant 1 : i32
    %6 = vector.broadcast %c1_i32 : i32 to vector<1x256xi32>
    %7 = arith.cmpi sge, %3, %6 : vector<1x256xi32>
    %c1_i32_1 = arith.constant 1 : i32
    %8 = vector.broadcast %c1_i32_1 : i32 to vector<1x256xi32>
    %9 = arith.cmpi sge, %5, %8 : vector<1x256xi32>
    %10 = arith.andi %7, %9 : vector<1x256xi1>
    %c1_i32_2 = arith.constant 1 : i32
    %11 = vector.broadcast %c1_i32_2 : i32 to vector<1x256xi32>
    %12 = arith.cmpi sge, %3, %11 : vector<1x256xi32>
    %c1_i32_3 = arith.constant 1 : i32
    %13 = vector.broadcast %c1_i32_3 : i32 to vector<1x256xi32>
    %14 = arith.cmpi sge, %3, %13 : vector<1x256xi32>
    %c15_i32_4 = arith.constant 15 : i32
    %15 = vector.broadcast %c15_i32_4 : i32 to vector<1x256xi32>
    %16 = arith.cmpi slt, %5, %15 : vector<1x256xi32>
    %17 = arith.andi %14, %16 : vector<1x256xi1>
    %c1_i32_5 = arith.constant 1 : i32
    %18 = vector.broadcast %c1_i32_5 : i32 to vector<1x256xi32>
    %19 = arith.cmpi sge, %5, %18 : vector<1x256xi32>
    %c15_i32_6 = arith.constant 15 : i32
    %20 = vector.broadcast %c15_i32_6 : i32 to vector<1x256xi32>
    %21 = arith.cmpi slt, %5, %20 : vector<1x256xi32>
    %c15_i32_7 = arith.constant 15 : i32
    %22 = vector.broadcast %c15_i32_7 : i32 to vector<1x256xi32>
    %23 = arith.cmpi slt, %3, %22 : vector<1x256xi32>
    %c1_i32_8 = arith.constant 1 : i32
    %24 = vector.broadcast %c1_i32_8 : i32 to vector<1x256xi32>
    %25 = arith.cmpi sge, %5, %24 : vector<1x256xi32>
    %26 = arith.andi %23, %25 : vector<1x256xi1>
    %c15_i32_9 = arith.constant 15 : i32
    %27 = vector.broadcast %c15_i32_9 : i32 to vector<1x256xi32>
    %28 = arith.cmpi slt, %3, %27 : vector<1x256xi32>
    %c15_i32_10 = arith.constant 15 : i32
    %29 = vector.broadcast %c15_i32_10 : i32 to vector<1x256xi32>
    %30 = arith.cmpi slt, %3, %29 : vector<1x256xi32>
    %c15_i32_11 = arith.constant 15 : i32
    %31 = vector.broadcast %c15_i32_11 : i32 to vector<1x256xi32>
    %32 = arith.cmpi slt, %5, %31 : vector<1x256xi32>
    %33 = arith.andi %30, %32 : vector<1x256xi1>
    %c17_i32 = arith.constant 17 : i32
    %34 = tpu.dynamic_rotate %0 by %c17_i32 dim 1 : vector<8x256xf32>, i32 -> vector<8x256xf32>
    %cst = arith.constant 0.000000e+00 : f32
    %35 = vector.shape_cast %10 : vector<1x256xi1> to vector<1x256xi1>
    %36 = vector.broadcast %35 : vector<1x256xi1> to vector<8x256xi1>
    %37 = vector.broadcast %cst : f32 to vector<8x256xf32>
    %38 = arith.select %36, %34, %37 : vector<8x256xi1>, vector<8x256xf32>
    %c16_i32 = arith.constant 16 : i32
    %39 = tpu.dynamic_rotate %0 by %c16_i32 dim 1 : vector<8x256xf32>, i32 -> vector<8x256xf32>
    %cst_12 = arith.constant 0.000000e+00 : f32
    %40 = vector.shape_cast %12 : vector<1x256xi1> to vector<1x256xi1>
    %41 = vector.broadcast %40 : vector<1x256xi1> to vector<8x256xi1>
    %42 = vector.broadcast %cst_12 : f32 to vector<8x256xf32>
    %43 = arith.select %41, %39, %42 : vector<8x256xi1>, vector<8x256xf32>
    %c15_i32_13 = arith.constant 15 : i32
    %44 = tpu.dynamic_rotate %0 by %c15_i32_13 dim 1 : vector<8x256xf32>, i32 -> vector<8x256xf32>
    %cst_14 = arith.constant 0.000000e+00 : f32
    %45 = vector.shape_cast %17 : vector<1x256xi1> to vector<1x256xi1>
    %46 = vector.broadcast %45 : vector<1x256xi1> to vector<8x256xi1>
    %47 = vector.broadcast %cst_14 : f32 to vector<8x256xf32>
    %48 = arith.select %46, %44, %47 : vector<8x256xi1>, vector<8x256xf32>
    %c1_i32_15 = arith.constant 1 : i32
    %49 = tpu.dynamic_rotate %0 by %c1_i32_15 dim 1 : vector<8x256xf32>, i32 -> vector<8x256xf32>
    %cst_16 = arith.constant 0.000000e+00 : f32
    %50 = vector.shape_cast %19 : vector<1x256xi1> to vector<1x256xi1>
    %51 = vector.broadcast %50 : vector<1x256xi1> to vector<8x256xi1>
    %52 = vector.broadcast %cst_16 : f32 to vector<8x256xf32>
    %53 = arith.select %51, %49, %52 : vector<8x256xi1>, vector<8x256xf32>
    %c255_i32 = arith.constant 255 : i32
    %54 = tpu.dynamic_rotate %0 by %c255_i32 dim 1 : vector<8x256xf32>, i32 -> vector<8x256xf32>
    %cst_17 = arith.constant 0.000000e+00 : f32
    %55 = vector.shape_cast %21 : vector<1x256xi1> to vector<1x256xi1>
    %56 = vector.broadcast %55 : vector<1x256xi1> to vector<8x256xi1>
    %57 = vector.broadcast %cst_17 : f32 to vector<8x256xf32>
    %58 = arith.select %56, %54, %57 : vector<8x256xi1>, vector<8x256xf32>
    %c241_i32 = arith.constant 241 : i32
    %59 = tpu.dynamic_rotate %0 by %c241_i32 dim 1 : vector<8x256xf32>, i32 -> vector<8x256xf32>
    %cst_18 = arith.constant 0.000000e+00 : f32
    %60 = vector.shape_cast %26 : vector<1x256xi1> to vector<1x256xi1>
    %61 = vector.broadcast %60 : vector<1x256xi1> to vector<8x256xi1>
    %62 = vector.broadcast %cst_18 : f32 to vector<8x256xf32>
    %63 = arith.select %61, %59, %62 : vector<8x256xi1>, vector<8x256xf32>
    %c240_i32 = arith.constant 240 : i32
    %64 = tpu.dynamic_rotate %0 by %c240_i32 dim 1 : vector<8x256xf32>, i32 -> vector<8x256xf32>
    %cst_19 = arith.constant 0.000000e+00 : f32
    %65 = vector.shape_cast %28 : vector<1x256xi1> to vector<1x256xi1>
    %66 = vector.broadcast %65 : vector<1x256xi1> to vector<8x256xi1>
    %67 = vector.broadcast %cst_19 : f32 to vector<8x256xf32>
    %68 = arith.select %66, %64, %67 : vector<8x256xi1>, vector<8x256xf32>
    %c239_i32 = arith.constant 239 : i32
    %69 = tpu.dynamic_rotate %0 by %c239_i32 dim 1 : vector<8x256xf32>, i32 -> vector<8x256xf32>
    %cst_20 = arith.constant 0.000000e+00 : f32
    %70 = vector.shape_cast %33 : vector<1x256xi1> to vector<1x256xi1>
    %71 = vector.broadcast %70 : vector<1x256xi1> to vector<8x256xi1>
    %72 = vector.broadcast %cst_20 : f32 to vector<8x256xf32>
    %73 = arith.select %71, %69, %72 : vector<8x256xi1>, vector<8x256xf32>
    %74 = tpu.concatenate %38, %43, %48, %53, %0, %58, %63, %68, %73 in 0 : vector<8x256xf32>, vector<8x256xf32>, vector<8x256xf32>, vector<8x256xf32>, vector<8x256xf32>, vector<8x256xf32>, vector<8x256xf32>, vector<8x256xf32>, vector<8x256xf32> -> vector<72x256xf32>
    %c0_21 = arith.constant 0 : index
    %c0_22 = arith.constant 0 : index
    %75 = vector.load %arg1[%c0_21, %c0_22] : memref<8x72xf32, #tpu.memory_space<vmem>>, vector<8x72xf32>
    %cst_23 = arith.constant dense<0.000000e+00> : vector<8x256xf32>
    %76 = tpu.matmul %75, %74, %cst_23 {dimension_numbers = #tpu.dot_dimension_numbers<[1], [0], [0], [1], [0, 0, 1, 1], [], []>, precision = #tpu.contract_precision<fp32>} : vector<8x72xf32>, vector<72x256xf32>, vector<8x256xf32> -> vector<8x256xf32>
    %77 = vector.extract_strided_slice %76 {offsets = [0, 0], sizes = [2, 256], strides = [1, 1]} : vector<8x256xf32> to vector<2x256xf32>
    %c0_24 = arith.constant 0 : index
    %78 = memref.load %arg2[%c0_24] : memref<3xf32, #tpu.memory_space<smem>>
    %79 = vector.broadcast %78 : f32 to vector<2x256xf32>
    %80 = arith.addf %77, %79 : vector<2x256xf32>
    %81 = vector.extract_strided_slice %76 {offsets = [2, 0], sizes = [2, 256], strides = [1, 1]} : vector<8x256xf32> to vector<2x256xf32>
    %c1 = arith.constant 1 : index
    %82 = memref.load %arg2[%c1] : memref<3xf32, #tpu.memory_space<smem>>
    %83 = vector.broadcast %82 : f32 to vector<2x256xf32>
    %84 = arith.addf %81, %83 : vector<2x256xf32>
    %85 = vector.extract_strided_slice %76 {offsets = [4, 0], sizes = [2, 256], strides = [1, 1]} : vector<8x256xf32> to vector<2x256xf32>
    %c2 = arith.constant 2 : index
    %86 = memref.load %arg2[%c2] : memref<3xf32, #tpu.memory_space<smem>>
    %87 = vector.broadcast %86 : f32 to vector<2x256xf32>
    %88 = arith.addf %85, %87 : vector<2x256xf32>
    %cst_25 = arith.constant 0.368427306 : f32
    %89 = vector.broadcast %cst_25 : f32 to vector<2x256xf32>
    %90 = arith.mulf %80, %89 : vector<2x256xf32>
    %cst_26 = arith.constant -0.686142802 : f32
    %91 = vector.broadcast %cst_26 : f32 to vector<2x256xf32>
    %92 = arith.mulf %84, %91 : vector<2x256xf32>
    %93 = arith.addf %90, %92 : vector<2x256xf32>
    %c17_i32_27 = arith.constant 17 : i32
    %94 = tpu.dynamic_rotate %93 by %c17_i32_27 dim 1 : vector<2x256xf32>, i32 -> vector<2x256xf32>
    %cst_28 = arith.constant 0.000000e+00 : f32
    %95 = vector.shape_cast %10 : vector<1x256xi1> to vector<1x256xi1>
    %96 = vector.broadcast %95 : vector<1x256xi1> to vector<2x256xi1>
    %97 = vector.broadcast %cst_28 : f32 to vector<2x256xf32>
    %98 = arith.select %96, %94, %97 : vector<2x256xi1>, vector<2x256xf32>
    %cst_29 = arith.constant 0.882496893 : f32
    %99 = vector.broadcast %cst_29 : f32 to vector<2x256xf32>
    %100 = arith.mulf %80, %99 : vector<2x256xf32>
    %c16_i32_30 = arith.constant 16 : i32
    %101 = tpu.dynamic_rotate %100 by %c16_i32_30 dim 1 : vector<2x256xf32>, i32 -> vector<2x256xf32>
    %cst_31 = arith.constant 0.000000e+00 : f32
    %102 = vector.shape_cast %12 : vector<1x256xi1> to vector<1x256xi1>
    %103 = vector.broadcast %102 : vector<1x256xi1> to vector<2x256xi1>
    %104 = vector.broadcast %cst_31 : f32 to vector<2x256xf32>
    %105 = arith.select %103, %101, %104 : vector<2x256xi1>, vector<2x256xf32>
    %106 = arith.addf %98, %105 : vector<2x256xf32>
    %cst_32 = arith.constant 0.368427306 : f32
    %107 = vector.broadcast %cst_32 : f32 to vector<2x256xf32>
    %108 = arith.mulf %80, %107 : vector<2x256xf32>
    %cst_33 = arith.constant 0.686142802 : f32
    %109 = vector.broadcast %cst_33 : f32 to vector<2x256xf32>
    %110 = arith.mulf %84, %109 : vector<2x256xf32>
    %111 = arith.addf %108, %110 : vector<2x256xf32>
    %c15_i32_34 = arith.constant 15 : i32
    %112 = tpu.dynamic_rotate %111 by %c15_i32_34 dim 1 : vector<2x256xf32>, i32 -> vector<2x256xf32>
    %cst_35 = arith.constant 0.000000e+00 : f32
    %113 = vector.shape_cast %17 : vector<1x256xi1> to vector<1x256xi1>
    %114 = vector.broadcast %113 : vector<1x256xi1> to vector<2x256xi1>
    %115 = vector.broadcast %cst_35 : f32 to vector<2x256xf32>
    %116 = arith.select %114, %112, %115 : vector<2x256xi1>, vector<2x256xf32>
    %117 = arith.addf %106, %116 : vector<2x256xf32>
    %cst_36 = arith.constant 0.417482853 : f32
    %118 = vector.broadcast %cst_36 : f32 to vector<2x256xf32>
    %119 = arith.mulf %80, %118 : vector<2x256xf32>
    %cst_37 = arith.constant -0.777501702 : f32
    %120 = vector.broadcast %cst_37 : f32 to vector<2x256xf32>
    %121 = arith.mulf %84, %120 : vector<2x256xf32>
    %122 = arith.addf %119, %121 : vector<2x256xf32>
    %c1_i32_38 = arith.constant 1 : i32
    %123 = tpu.dynamic_rotate %122 by %c1_i32_38 dim 1 : vector<2x256xf32>, i32 -> vector<2x256xf32>
    %cst_39 = arith.constant 0.000000e+00 : f32
    %124 = vector.shape_cast %19 : vector<1x256xi1> to vector<1x256xi1>
    %125 = vector.broadcast %124 : vector<1x256xi1> to vector<2x256xi1>
    %126 = vector.broadcast %cst_39 : f32 to vector<2x256xf32>
    %127 = arith.select %125, %123, %126 : vector<2x256xi1>, vector<2x256xf32>
    %128 = arith.addf %117, %127 : vector<2x256xf32>
    %129 = arith.addf %128, %80 : vector<2x256xf32>
    %cst_40 = arith.constant 0.417482853 : f32
    %130 = vector.broadcast %cst_40 : f32 to vector<2x256xf32>
    %131 = arith.mulf %80, %130 : vector<2x256xf32>
    %cst_41 = arith.constant 0.777501702 : f32
    %132 = vector.broadcast %cst_41 : f32 to vector<2x256xf32>
    %133 = arith.mulf %84, %132 : vector<2x256xf32>
    %134 = arith.addf %131, %133 : vector<2x256xf32>
    %c255_i32_42 = arith.constant 255 : i32
    %135 = tpu.dynamic_rotate %134 by %c255_i32_42 dim 1 : vector<2x256xf32>, i32 -> vector<2x256xf32>
    %cst_43 = arith.constant 0.000000e+00 : f32
    %136 = vector.shape_cast %21 : vector<1x256xi1> to vector<1x256xi1>
    %137 = vector.broadcast %136 : vector<1x256xi1> to vector<2x256xi1>
    %138 = vector.broadcast %cst_43 : f32 to vector<2x256xf32>
    %139 = arith.select %137, %135, %138 : vector<2x256xi1>, vector<2x256xf32>
    %140 = arith.addf %129, %139 : vector<2x256xf32>
    %cst_44 = arith.constant 0.368427306 : f32
    %141 = vector.broadcast %cst_44 : f32 to vector<2x256xf32>
    %142 = arith.mulf %80, %141 : vector<2x256xf32>
    %cst_45 = arith.constant -0.686142802 : f32
    %143 = vector.broadcast %cst_45 : f32 to vector<2x256xf32>
    %144 = arith.mulf %84, %143 : vector<2x256xf32>
    %145 = arith.addf %142, %144 : vector<2x256xf32>
    %c241_i32_46 = arith.constant 241 : i32
    %146 = tpu.dynamic_rotate %145 by %c241_i32_46 dim 1 : vector<2x256xf32>, i32 -> vector<2x256xf32>
    %cst_47 = arith.constant 0.000000e+00 : f32
    %147 = vector.shape_cast %26 : vector<1x256xi1> to vector<1x256xi1>
    %148 = vector.broadcast %147 : vector<1x256xi1> to vector<2x256xi1>
    %149 = vector.broadcast %cst_47 : f32 to vector<2x256xf32>
    %150 = arith.select %148, %146, %149 : vector<2x256xi1>, vector<2x256xf32>
    %151 = arith.addf %140, %150 : vector<2x256xf32>
    %cst_48 = arith.constant 0.882496893 : f32
    %152 = vector.broadcast %cst_48 : f32 to vector<2x256xf32>
    %153 = arith.mulf %80, %152 : vector<2x256xf32>
    %c240_i32_49 = arith.constant 240 : i32
    %154 = tpu.dynamic_rotate %153 by %c240_i32_49 dim 1 : vector<2x256xf32>, i32 -> vector<2x256xf32>
    %cst_50 = arith.constant 0.000000e+00 : f32
    %155 = vector.shape_cast %28 : vector<1x256xi1> to vector<1x256xi1>
    %156 = vector.broadcast %155 : vector<1x256xi1> to vector<2x256xi1>
    %157 = vector.broadcast %cst_50 : f32 to vector<2x256xf32>
    %158 = arith.select %156, %154, %157 : vector<2x256xi1>, vector<2x256xf32>
    %159 = arith.addf %151, %158 : vector<2x256xf32>
    %cst_51 = arith.constant 0.368427306 : f32
    %160 = vector.broadcast %cst_51 : f32 to vector<2x256xf32>
    %161 = arith.mulf %80, %160 : vector<2x256xf32>
    %cst_52 = arith.constant 0.686142802 : f32
    %162 = vector.broadcast %cst_52 : f32 to vector<2x256xf32>
    %163 = arith.mulf %84, %162 : vector<2x256xf32>
    %164 = arith.addf %161, %163 : vector<2x256xf32>
    %c239_i32_53 = arith.constant 239 : i32
    %165 = tpu.dynamic_rotate %164 by %c239_i32_53 dim 1 : vector<2x256xf32>, i32 -> vector<2x256xf32>
    %cst_54 = arith.constant 0.000000e+00 : f32
    %166 = vector.shape_cast %33 : vector<1x256xi1> to vector<1x256xi1>
    %167 = vector.broadcast %166 : vector<1x256xi1> to vector<2x256xi1>
    %168 = vector.broadcast %cst_54 : f32 to vector<2x256xf32>
    %169 = arith.select %167, %165, %168 : vector<2x256xi1>, vector<2x256xf32>
    %170 = arith.addf %159, %169 : vector<2x256xf32>
    %171 = tpu.concatenate %170, %88 in 0 : vector<2x256xf32>, vector<2x256xf32> -> vector<4x256xf32>
    %c0_55 = arith.constant 0 : index
    %c0_56 = arith.constant 0 : index
    %172 = vector.load %arg3[%c0_55, %c0_56] : memref<4x256xf32, #tpu.memory_space<vmem>>, vector<4x256xf32>
    tpu.vector_store %arg3[%c0_55, %c0_56], %171 {strides = array<i32>} : memref<4x256xf32, #tpu.memory_space<vmem>>, vector<4x256xf32>,
    return
  }
}

</mosaic_0001>

<bundles_post_ra>
// kernel: forward.1
= control target key start
LH: loop header
LB: loop body
LE: loop exit
PB: predicated region body
PF: predicated region fallthrough
CT: control target
= control target key end

     0   :  { %8 = vsyncpa [#allocation3], 0  ;;  %s1672_s0 = inlined_call_operand.vmem [shape: f32[8,256], index: 0, kind: input, shape index: {}]   ;;  %s1673_s1 = inlined_call_operand.vmem [shape: f32[8,72], index: 1, kind: input, shape index: {}]   ;;  %s1674_s2 = inlined_call_operand.vmem [shape: f32[3], index: 2, kind: input, shape index: {}]   ;;  %s1675_s3 = inlined_call_operand.vmem [shape: f32[4,256], index: 3, kind: output, shape index: {}]  }
   0x1   :  { %s19_s14 = sshll.u32 %s1674_s2, 4  ;;  %s20_s14 = int_to_ptr.vmem [resolvable:$true] %s19_s14 }
   0x2   :  { %s1003_s15 = scalar_lea.vmem %s20_s14, 16  ;;  %p1008_p1 = scmp.lt.s32.totalorder %s20_s14, %s20_s14 }
   0x3   :  { %p1004_p0 = scmp.ne.s32.totalorder %s20_s14, %s1003_s15  ;;  %p1009_p2 = scmp.lt.s32.totalorder %s1003_s15, %s1003_s15 }
   0x5   :  { %p1010_p3 = por %p1009_p2, %p1008_p1 }
   0x7   :  { %p1011_p4 = pnand %p1010_p3, %p1004_p0 }
   0x9   :  { %1014 = shalt.err (!%p1011_p4)
}
   0xa   :  { %s1017_s16 = smov [#allocation2]  }
   0xb   :  { %22 = dma.vmem_to_smem %s20_s14, 16, %s1017_s16, [#allocation3]  }
   0xc   :  { %1015 = dma.done.wait [#allocation3], 16  }
   0xd   :  { %1016 = vsyncadd [#allocation3], 4294967280 }
   0xe   :  { %26 = sfence }
   0xf   :  { %v27_v0 = vld [vmem:[%s1672_s0] sm:$0xff]  ;;  %s1018_s19 = smov 112   ;;  %s1019_s2 = smov 111   ;;  %v28_v1 = vld [vmem:[%s1672_s0 + $0x8] sm:$0xff]  ;;  %v1024_v2 = vmov 0.0   ;;  %v29_v3 = vlaneseq  ;;  %vm157_vm4 = vcmask 588800  }
  0x10   :  { %130 = vrot.lane.b32.xlu1 %v27_v0, %s1018_s19  ;;  %143 = vrot.lane.b32.xlu0 %v27_v0, %s1019_s2  ;;  %s1020_s22 = smov 113   ;;  %s1021_s23 = smov 127   ;;  %v1077_v6 = vand.u32 4294901760, %v28_v1  ;;  %v1081_v11 = vand.u32 4294901760, %v27_v0  ;;  %v156_v21 = vld [vmem:[%s1673_s1] sm:$0xff] }
  0x11   :  { %s1022_s24 = smov 1   ;;  %s1023_s0 = smov 15   ;;  %243 = vmatprep.mubr.f32.mxu0 %v1024_v2  ;;  %409 = vmatprep.mubr.f32.mxu1 %v1024_v2  ;;  %v1074_v4 = vand.u32 127, %v29_v3  ;;  %v1135_v28 = vsel %vm157_vm4, %v156_v21, 0 }
  0x12   :  { %s1025_s25 = smov 16   ;;  %s1026_s26 = smov 17   ;;  %v1084_v12 = vsub.f32 %v28_v1, %v1077_v6  ;;  %v1104_v20 = vsub.f32 %v27_v0, %v1081_v11  ;;  %v1210_v53 = vand.u32 4294901760, %v1135_v28 }
  0x13   :  { %v31_v5 = vadd.s32 128, %v1074_v4  ;;  %v32_v7 = vshra.s32 %v1074_v4, 4  ;;  %v34_v8 = vand.u32 15, %v1074_v4  ;;  %vm1686_vm5 = vcmp.lt.s32.totalorder %v1074_v4, 112  ;;  %s834_s1 = sld [smem:[#allocation2]] }
  0x14   :  { %132 = vrot.lane.b32.xlu1 %v28_v1, %s1018_s19  ;;  %145 = vrot.lane.b32.xlu0 %v28_v1, %s1019_s2  ;;  %v1683_v19 = vand.u32 4294901760, %v1084_v12  ;;  %vm1678_vm7 = vcmp.lt.s32.totalorder %v1074_v4, 111  ;;  %vm1681_vm10 = vcmp.lt.s32.totalorder %v1074_v4, 113  ;;  %vm1687_vm11 = vcmp.lt.s32.totalorder %v1074_v4, 127  ;;  %s991_s29 = sld [smem:[#allocation2 + $0x1]] }
  0x15   :  { %v33_v9 = vshra.s32 %v31_v5, 4  ;;  %v35_v10 = vand.u32 15, %v31_v5  ;;  %vm1086_vm0 = vcmp.lt.s32.totalorder %v32_v7, 15  ;;  %vm1090_vm1 = vcmp.lt.s32.totalorder %v34_v8, 15  ;;  %s992_s30 = sld [smem:[#allocation2 + $0x2]] }
  0x16   :  { %vm1677_vm6 = vmand %vm1086_vm0, %vm1090_vm1  ;;  %vm1119_vm9 = vcmp.ge.s32.totalorder %v34_v8, 1  ;;  %v1132_v26 = vsub.f32 %v1084_v12, %v1683_v19  ;;  %v1682_v27 = vand.u32 4294901760, %v1104_v20  ;;  %vm95_vm15 = vcmp.lt.s32.totalorder %v1074_v4, 1 }
  0x17   :  { %vm1094_vm2 = vcmp.lt.s32.totalorder %v33_v9, 15  ;;  %vm1098_vm3 = vcmp.lt.s32.totalorder %v35_v10, 15  ;;  %vm1125_vm12 = vcmp.ge.s32.totalorder %v35_v10, 1  ;;  %vm1680_vm13 = vmand %vm1086_vm0, %vm1119_vm9  ;;  %vm1176_vm4 = vcmp.ge.s32.totalorder %v32_v7, 1 }
  0x18   :  { %119 = vrot.lane.b32.xlu1 %v28_v1, %s1020_s22  ;;  %117 = vrot.lane.b32.xlu0 %v27_v0, %s1020_s22  ;;  %vm1676_vm8 = vmand %vm1094_vm2, %vm1098_vm3  ;;  %v321_v45 = vand.u32 4294901760, %v1132_v26  ;;  %v1207_v52 = vsub.f32 %v1104_v20, %v1682_v27 }
  0x19   :  { %vm1679_vm14 = vmand %vm1094_vm2, %vm1125_vm12 }
  0x1c   :  { %106 = vrot.lane.b32.xlu1 %v28_v1, %s1021_s23  ;;  %104 = vrot.lane.b32.xlu0 %v27_v0, %s1021_s23 }
  0x20   :  { %93 = vrot.lane.b32.xlu1 %v28_v1, %s1022_s24  ;;  %91 = vrot.lane.b32.xlu0 %v27_v0, %s1022_s24 }
  0x24   :  { %80 = vrot.lane.b32.xlu1 %v28_v1, %s1023_s0  ;;  %78 = vrot.lane.b32.xlu0 %v27_v0, %s1023_s0 }
  0x28   :  { %67 = vrot.lane.b32.xlu1 %v28_v1, %s1025_s25  ;;  %65 = vrot.lane.b32.xlu0 %v27_v0, %s1025_s25 }
  0x2c   :  { %54 = vrot.lane.b32.xlu1 %v28_v1, %s1026_s26  ;;  %52 = vrot.lane.b32.xlu0 %v27_v0, %s1026_s26 }
  0x82   :  { %v131_v15 = vpop.permute.xlu1 %130  ;;  %v144_v16 = vpop.permute.xlu0 %143 }
  0x86   :  { %v133_v23 = vpop.permute.xlu1 %132  ;;  %v146_v24 = vpop.permute.xlu0 %145 }
  0x87   :  { %v135_v29 = vsel %vm1686_vm5, %v131_v15, %v133_v23  ;;  %v136_v30 = vsel %vm1686_vm5, %v133_v23, %v131_v15  ;;  %v148_v31 = vsel %vm1678_vm7, %v144_v16, %v146_v24  ;;  %v149_v32 = vsel %vm1678_vm7, %v146_v24, %v144_v16  ;;  %vm40_vm5 = vmand %vm1176_vm4, %vm1119_vm9 }
  0x88   :  { %v141_v33 = vsel %vm1086_vm0, %v135_v29, 0.0  ;;  %v142_v34 = vsel %vm1094_vm2, %v136_v30, 0.0  ;;  %v154_v35 = vsel %vm1677_vm6, %v148_v31, 0.0  ;;  %v155_v36 = vsel %vm1676_vm8, %v149_v32, 0.0 }
  0x89   :  { %v1159_v37 = vand.u32 4294901760, %v142_v34  ;;  %v1161_v38 = vand.u32 4294901760, %v141_v33  ;;  %v1163_v39 = vand.u32 4294901760, %v155_v36  ;;  %v1165_v40 = vand.u32 4294901760, %v154_v35 }
  0x8a   :  { %v120_v41 = vpop.permute.xlu1 %119  ;;  %v118_v42 = vpop.permute.xlu0 %117  ;;  %vm1180_vm8 = vcmp.ge.s32.totalorder %v33_v9, 1  ;;  %vm82_vm6 = vcmp.lt.s32.totalorder %v1074_v4, 15  ;;  %vm69_vm7 = vcmp.lt.s32.totalorder %v1074_v4, 16 }
  0x8b   :  { %v1186_v46 = vsub.f32 %v142_v34, %v1159_v37  ;;  %v1189_v47 = vsub.f32 %v141_v33, %v1161_v38  ;;  %v1192_v48 = vsub.f32 %v155_v36, %v1163_v39  ;;  %v1195_v49 = vsub.f32 %v154_v35, %v1165_v40  ;;  %176 = vmatprep.subr.mxu0 %v1163_v39 }
  0x8c   :  { %v122_v50 = vsel %vm1681_vm10, %v118_v42, %v120_v41  ;;  %v123_v51 = vsel %vm1681_vm10, %v120_v41, %v118_v42  ;;  %178 = vmatpush1.msra.mxu0 %v1165_v40  ;;  %vm56_vm10 = vcmp.lt.s32.totalorder %v1074_v4, 17 }
  0x8d   :  { %v128_v54 = vsel %vm1680_vm13, %v122_v50, 0.0  ;;  %v129_v55 = vsel %vm1679_vm14, %v123_v51, 0.0  ;;  %180 = vmatprep.subr.mxu0 %v1159_v37  ;;  %v271_v56 = vand.u32 4294901760, %v1192_v48  ;;  %v277_v57 = vand.u32 4294901760, %v1195_v49  ;;  %vm44_vm14 = vmand %vm1176_vm4, %vm1090_vm1 }
  0x8e   :  { %v1225_v58 = vand.u32 4294901760, %v129_v55  ;;  %v1227_v59 = vand.u32 4294901760, %v128_v54  ;;  %v107_v60 = vpop.permute.xlu1 %106  ;;  %182 = vmatpush1.msra.mxu0 %v1161_v38  ;;  %v105_v61 = vpop.permute.xlu0 %104  ;;  %v283_v62 = vand.u32 4294901760, %v1186_v46  ;;  %v1694_v63 = vand.u32 4294901760, %v1189_v47  ;;  %vm45_vm13 = vmand %vm1180_vm8, %vm1098_vm3 }
  0x8f   :  { %v109_v0 = vsel %vm1687_vm11, %v105_v61, %v107_v60  ;;  %v110_v1 = vsel %vm1687_vm11, %v107_v60, %v105_v61  ;;  %v272_v3 = vsub.f32 %v1192_v48, %v271_v56  ;;  %v278_v5 = vsub.f32 %v1195_v49, %v277_v57  ;;  %vm41_vm11 = vmand %vm1180_vm8, %vm1125_vm12 }
  0x90   :  { %v1243_v7 = vsub.f32 %v129_v55, %v1225_v58  ;;  %v1246_v8 = vsub.f32 %v128_v54, %v1227_v59  ;;  %v115_v9 = vsel %vm1090_vm1, %v109_v0, 0.0  ;;  %v116_v10 = vsel %vm1098_vm3, %v110_v1, 0.0  ;;  %184 = vmatprep.subr.mxu0 %v1225_v58 }
  0x91   :  { %v1254_v15 = vand.u32 4294901760, %v116_v10  ;;  %v1256_v16 = vand.u32 4294901760, %v115_v9  ;;  %186 = vmatpush1.msra.mxu0 %v1227_v59  ;;  %v273_v21 = vand.u32 4294901760, %v272_v3  ;;  %v279_v23 = vand.u32 4294901760, %v278_v5 }
  0x92   :  { %v94_v24 = vpop.permute.xlu1 %93  ;;  %v92_v29 = vpop.permute.xlu0 %91  ;;  %v284_v30 = vsub.f32 %v1186_v46, %v283_v62  ;;  %v290_v31 = vsub.f32 %v1189_v47, %v1694_v63  ;;  %v1689_v32 = vand.u32 4294901760, %v1243_v7  ;;  %v1688_v33 = vand.u32 4294901760, %v1246_v8 }
  0x93   :  { %v1268_v34 = vsub.f32 %v116_v10, %v1254_v15  ;;  %v1271_v35 = vsub.f32 %v115_v9, %v1256_v16  ;;  %v96_v36 = vsel %vm95_vm15, %v92_v29, %v94_v24  ;;  %v97_v41 = vsel %vm95_vm15, %v94_v24, %v92_v29  ;;  %188 = vmatprep.subr.mxu0 %v1254_v15 }
  0x94   :  { %v102_v42 = vsel %vm1119_vm9, %v97_v41, 0.0  ;;  %v103_v50 = vsel %vm1125_vm12, %v96_v36, 0.0  ;;  %274 = vmatprep.subr.mxu1 %v273_v21  ;;  %190 = vmatpush1.msra.mxu0 %v1256_v16  ;;  %v285_v51 = vand.u32 4294901760, %v284_v30  ;;  %v291_v54 = vand.u32 4294901760, %v290_v31 }
  0x95   :  { %v1287_v55 = vand.u32 4294901760, %v103_v50  ;;  %v1289_v60 = vand.u32 4294901760, %v102_v42  ;;  %280 = vmatpush1.msra.mxu1 %v279_v23  ;;  %192 = vmatprep.subr.mxu0 %v1077_v6  ;;  %v296_v61 = vsub.f32 %v1243_v7, %v1689_v32  ;;  %v302_v0 = vsub.f32 %v1246_v8, %v1688_v33 }
  0x96   :  { %286 = vmatprep.subr.mxu1 %v285_v51  ;;  %v81_v1 = vpop.permute.xlu1 %80  ;;  %v79_v3 = vpop.permute.xlu0 %78  ;;  %194 = vmatpush1.msra.mxu0 %v1081_v11  ;;  %v1685_v5 = vand.u32 4294901760, %v1268_v34  ;;  %v1684_v9 = vand.u32 4294901760, %v1271_v35  ;;  %v1308_v10 = vsub.f32 %v1135_v28, %v1210_v53 }
  0x97   :  { %v1311_v21 = vsub.f32 %v103_v50, %v1287_v55  ;;  %v1314_v23 = vsub.f32 %v102_v42, %v1289_v60  ;;  %292 = vmatpush1.msra.mxu1 %v291_v54  ;;  %v83_v24 = vsel %vm82_vm6, %v79_v3, %v81_v1  ;;  %v84_v29 = vsel %vm82_vm6, %v81_v1, %v79_v3 }
  0x98   :  { %v89_v28 = vsel %vm44_vm14, %v84_v29, 0.0  ;;  %v90_v30 = vsel %vm45_vm13, %v83_v24, 0.0  ;;  %196 = vmatprep.subr.mxu0 %v1287_v55  ;;  %v297_v31 = vand.u32 4294901760, %v296_v61  ;;  %v303_v36 = vand.u32 4294901760, %v302_v0 }
  0x99   :  { %v1331_v41 = vand.u32 4294901760, %v90_v30  ;;  %v1333_v42 = vand.u32 4294901760, %v89_v28  ;;  %198 = vmatpush1.msra.mxu0 %v1289_v60  ;;  %v308_v50 = vsub.f32 %v1268_v34, %v1685_v5  ;;  %v314_v51 = vsub.f32 %v1271_v35, %v1684_v9 }
  0x9a   :  { %298 = vmatprep.subr.mxu1 %v297_v31  ;;  %v68_v54 = vpop.permute.xlu1 %67  ;;  %v66_v1 = vpop.permute.xlu0 %65  ;;  %v327_v61 = vand.u32 4294901760, %v1207_v52  ;;  %v1690_v0 = vand.u32 4294901760, %v1311_v21  ;;  %v1691_v3 = vand.u32 4294901760, %v1314_v23  ;;  %v1692_v24 = vand.u32 4294901760, %v1308_v10 }
  0x9b   :  { %v1347_v29 = vsub.f32 %v90_v30, %v1331_v41  ;;  %v1350_v27 = vsub.f32 %v89_v28, %v1333_v42  ;;  %304 = vmatpush1.msra.mxu1 %v303_v36  ;;  %v70_v31 = vsel %vm69_vm7, %v66_v1, %v68_v54  ;;  %v71_v19 = vsel %vm69_vm7, %v68_v54, %v66_v1 }
  0x9c   :  { %v76_v52 = vsel %vm1176_vm4, %v71_v19, 0.0  ;;  %v77_v9 = vsel %vm1180_vm8, %v70_v31, 0.0  ;;  %200 = vmatprep.subr.mxu0 %v1331_v41  ;;  %v309_v30 = vand.u32 4294901760, %v308_v50  ;;  %v315_v5 = vand.u32 4294901760, %v314_v51 }
  0x9d   :  { %v1365_v28 = vand.u32 4294901760, %v77_v9  ;;  %v1367_v36 = vand.u32 4294901760, %v76_v52  ;;  %202 = vmatpush1.msra.mxu0 %v1333_v42  ;;  %v332_v19 = vsub.f32 %v1311_v21, %v1690_v0  ;;  %v338_v50 = vsub.f32 %v1314_v23, %v1691_v3 }
  0x9e   :  { %310 = vmatprep.subr.mxu1 %v309_v30  ;;  %v55_v51 = vpop.permute.xlu1 %54  ;;  %v53_v54 = vpop.permute.xlu0 %52  ;;  %v1693_v1 = vand.u32 4294901760, %v1347_v29  ;;  %v349_v31 = vand.u32 4294901760, %v1350_v27  ;;  %v247_v33 = vsub.f32 %v1308_v10, %v1692_v24 }
  0x9f   :  { %v1386_v32 = vsub.f32 %v77_v9, %v1365_v28  ;;  %v1389_v0 = vsub.f32 %v76_v52, %v1367_v36  ;;  %316 = vmatpush1.msra.mxu1 %v315_v5  ;;  %v57_v30 = vsel %vm56_vm10, %v53_v54, %v55_v51  ;;  %v58_v3 = vsel %vm56_vm10, %v55_v51, %v53_v54 }
  0xa0   :  { %322 = vmatprep.subr.mxu1 %v321_v45  ;;  %v63_v9 = vsel %vm40_vm5, %v58_v3, 0.0  ;;  %v64_v5 = vsel %vm41_vm11, %v57_v30, 0.0  ;;  %204 = vmatprep.subr.mxu0 %v1365_v28  ;;  %v333_v52 = vand.u32 4294901760, %v332_v19  ;;  %v339_v24 = vand.u32 4294901760, %v338_v50 }
  0xa1   :  { %v1408_v51 = vand.u32 4294901760, %v64_v5  ;;  %v1410_v26 = vand.u32 4294901760, %v63_v9  ;;  %328 = vmatpush1.msra.mxu1 %v327_v61  ;;  %206 = vmatpush1.msra.mxu0 %v1367_v36  ;;  %v344_v45 = vsub.f32 %v1347_v29, %v1693_v1  ;;  %v350_v3 = vsub.f32 %v1350_v27, %v349_v31 }
  0xa2   :  { %334 = vmatprep.subr.mxu1 %v333_v52  ;;  %v248_v54 = vand.u32 4294901760, %v247_v33  ;;  %v355_v19 = vand.u32 4294901760, %v1386_v32  ;;  %v361_v50 = vand.u32 4294901760, %v1389_v0 }
  0xa3   :  { %v1422_v30 = vsub.f32 %v64_v5, %v1408_v51  ;;  %v1425_v61 = vsub.f32 %v63_v9, %v1410_v26  ;;  %340 = vmatpush1.msra.mxu1 %v339_v24  ;;  %208 = vmatprep.subr.mxu0 %v1408_v51  ;;  %v345_v1 = vand.u32 4294901760, %v344_v45  ;;  %v351_v63 = vand.u32 4294901760, %v350_v3 }
  0xa4   :  { %210 = vmatpush1.msra.mxu0 %v1410_v26  ;;  %v356_v33 = vsub.f32 %v1386_v32, %v355_v19  ;;  %v362_v52 = vsub.f32 %v1389_v0, %v361_v50 }
  0xa5   :  { %346 = vmatprep.subr.mxu1 %v345_v1  ;;  %433 = vmatprep.subr.mxu0 %v1192_v48  ;;  %v367_v9 = vand.u32 4294901760, %v1422_v30  ;;  %v373_v24 = vand.u32 4294901760, %v1425_v61  ;;  %v1712_v48 = vand.u32 4294901760, %v1243_v7 }
  0xa6   :  { %352 = vmatpush1.msra.mxu1 %v351_v63  ;;  %249 = vmatmul.mubr.f32.vlgmr.msra.gmra.mxu0 %v248_v54  ;;  %v357_v5 = vand.u32 4294901760, %v356_v33  ;;  %v363_v45 = vand.u32 4294901760, %v362_v52  ;;  %v1711_v33 = vand.u32 4294901760, %v1189_v47 }
  0xa7   :  { %436 = vmatpush1.msra.mxu0 %v1195_v49  ;;  %v368_v3 = vsub.f32 %v1422_v30, %v367_v9  ;;  %v374_v1 = vsub.f32 %v1425_v61, %v373_v24  ;;  %517 = vmatprep.mubr.f32.mxu0 %v1024_v2  ;;  %v1713_v49 = vand.u32 4294901760, %v1246_v8 }
  0xa8   :  { %358 = vmatprep.subr.mxu1 %v357_v5  ;;  %439 = vmatprep.subr.mxu0 %v1186_v46  ;;  %v1714_v46 = vand.u32 4294901760, %v1268_v34 }
  0xa9   :  { %364 = vmatpush1.msra.mxu1 %v363_v45  ;;  %442 = vmatpush1.msra.mxu0 %v1189_v47  ;;  %v369_v63 = vand.u32 4294901760, %v368_v3  ;;  %v375_v54 = vand.u32 4294901760, %v374_v1  ;;  %v1715_v47 = vand.u32 4294901760, %v1271_v35 }
  0xaa   :  { %445 = vmatprep.subr.mxu0 %v1243_v7  ;;  %v1719_v7 = vand.u32 4294901760, %v1311_v21 }
  0xab   :  { %448 = vmatpush1.msra.mxu0 %v1246_v8  ;;  %370 = vmatprep.subr.mxu1 %v369_v63  ;;  %v1720_v8 = vand.u32 4294901760, %v1314_v23 }
  0xac   :  { %451 = vmatprep.subr.mxu0 %v1268_v34  ;;  %376 = vmatpush1.msra.mxu1 %v375_v54 }
  0xad   :  { %454 = vmatpush1.msra.mxu0 %v1271_v35  ;;  %411 = vmatmul.mubr.f32.vlgmr.msra.gmra.mxu1 %v1210_v53 }
  0xae   :  { %457 = vmatprep.subr.mxu0 %v1084_v12  ;;  %541 = vmatprep.subr.mxu1 %v1163_v39 }
  0xaf   :  { %460 = vmatpush1.msra.mxu0 %v1104_v20  ;;  %543 = vmatpush1.msra.mxu1 %v1165_v40 }
  0xb0   :  { %463 = vmatprep.subr.mxu0 %v1311_v21  ;;  %545 = vmatprep.subr.mxu1 %v1159_v37 }
  0xb1   :  { %466 = vmatpush1.msra.mxu0 %v1314_v23  ;;  %547 = vmatpush1.msra.mxu1 %v1161_v38 }
  0xb2   :  { %469 = vmatprep.subr.mxu0 %v1347_v29  ;;  %549 = vmatprep.subr.mxu1 %v1225_v58 }
  0xb3   :  { %472 = vmatpush1.msra.mxu0 %v1350_v27  ;;  %551 = vmatpush1.msra.mxu1 %v1227_v59 }
  0xb4   :  { %475 = vmatprep.subr.mxu0 %v1386_v32  ;;  %553 = vmatprep.subr.mxu1 %v1254_v15 }
  0xb5   :  { %478 = vmatpush1.msra.mxu0 %v1389_v0  ;;  %555 = vmatpush1.msra.mxu1 %v1256_v16 }
  0xb6   :  { %481 = vmatprep.subr.mxu0 %v1422_v30  ;;  %557 = vmatprep.subr.mxu1 %v1077_v6 }
  0xb7   :  { %484 = vmatpush1.msra.mxu0 %v1425_v61  ;;  %559 = vmatpush1.msra.mxu1 %v1081_v11 }
  0xb8   :  { %520 = vmatmul.mubr.f32.vlgmr.msra.gmra.mxu0 %v1308_v10  ;;  %561 = vmatprep.subr.mxu1 %v1287_v55 }
  0xb9   :  { %635 = vmatprep.subr.mxu0 %v271_v56  ;;  %563 = vmatpush1.msra.mxu1 %v1289_v60  ;;  %v1716_v56 = vand.u32 4294901760, %v1308_v10  ;;  %v839_v10 = vstv %s991_s29 }
  0xba   :  { %639 = vmatpush1.msra.mxu0 %v277_v57  ;;  %565 = vmatprep.subr.mxu1 %v1331_v41  ;;  %v1717_v57 = vand.u32 4294901760, %v1084_v12  ;;  %v1721_v12 = vand.u32 4294901760, %v1347_v29 }
  0xbb   :  { %643 = vmatprep.subr.mxu0 %v283_v62  ;;  %567 = vmatpush1.msra.mxu1 %v1333_v42  ;;  %v1718_v62 = vand.u32 4294901760, %v1104_v20 }
  0xbc   :  { %647 = vmatpush1.msra.mxu0 %v1711_v33  ;;  %569 = vmatprep.subr.mxu1 %v1365_v28 }
  0xbd   :  { %651 = vmatprep.subr.mxu0 %v1712_v48  ;;  %571 = vmatpush1.msra.mxu1 %v1367_v36 }
  0xbe   :  { %655 = vmatpush1.msra.mxu0 %v1713_v49  ;;  %573 = vmatprep.subr.mxu1 %v1408_v51 }
  0xbf   :  { %659 = vmatprep.subr.mxu0 %v1714_v46  ;;  %575 = vmatpush1.msra.mxu1 %v1410_v26 }
  0xc0   :  { %608 = vmatprep.mubr.f32.mxu1 %v1024_v2  ;;  %663 = vmatpush1.msra.mxu0 %v1715_v47 }
  0xc1   :  { %612 = vmatmul.mubr.f32.vlgmr.msra.gmra.mxu1 %v1716_v56  ;;  %667 = vmatprep.subr.mxu0 %v1717_v57 }
  0xc2   :  { %759 = vmatprep.subr.mxu1 %v1163_v39  ;;  %671 = vmatpush1.msra.mxu0 %v1718_v62 }
  0xc3   :  { %761 = vmatpush1.msra.mxu1 %v1165_v40  ;;  %675 = vmatprep.subr.mxu0 %v1719_v7 }
  0xc4   :  { %763 = vmatprep.subr.mxu1 %v1159_v37  ;;  %679 = vmatpush1.msra.mxu0 %v1720_v8 }
  0xc5   :  { %765 = vmatpush1.msra.mxu1 %v1161_v38  ;;  %683 = vmatprep.subr.mxu0 %v1721_v12 }
  0xc6   :  { %767 = vmatprep.subr.mxu1 %v1225_v58  ;;  %687 = vmatpush1.msra.mxu0 %v349_v31 }
  0xc7   :  { %769 = vmatpush1.msra.mxu1 %v1227_v59  ;;  %691 = vmatprep.subr.mxu0 %v355_v19 }
  0xc8   :  { %771 = vmatprep.subr.mxu1 %v1254_v15  ;;  %695 = vmatpush1.msra.mxu0 %v361_v50 }
  0xc9   :  { %773 = vmatpush1.msra.mxu1 %v1256_v16  ;;  %699 = vmatprep.subr.mxu0 %v367_v9 }
  0xca   :  { %775 = vmatprep.subr.mxu1 %v1077_v6  ;;  %703 = vmatpush1.msra.mxu0 %v373_v24 }
  0xcb   :  { %736 = vmatprep.mubr.f32.mxu0 %v1024_v2  ;;  %777 = vmatpush1.msra.mxu1 %v1081_v11 }
  0xcc   :  { %738 = vmatmul.mubr.f32.vlgmr.msra.gmra.mxu0 %v1210_v53  ;;  %779 = vmatprep.subr.mxu1 %v1287_v55 }
  0xcd   :  { %781 = vmatpush1.msra.mxu1 %v1289_v60  ;;  %826 = vmatprep.mubr.f32.mxu1 %v1024_v2  ;;  %v835_v60 = vstv %s834_s1 }
  0xce   :  { %783 = vmatprep.subr.mxu1 %v1331_v41 }
  0xcf   :  { %785 = vmatpush1.msra.mxu1 %v1333_v42 }
  0xd0   :  { %787 = vmatprep.subr.mxu1 %v1365_v28 }
  0xd1   :  { %789 = vmatpush1.msra.mxu1 %v1367_v36 }
  0xd2   :  { %791 = vmatprep.subr.mxu1 %v1408_v51 }
  0xd3   :  { %793 = vmatpush1.msra.mxu1 %v1410_v26 }
  0xd4   :  { %828 = vmatmul.mubr.f32.vlgmr.msra.gmra.mxu1 %v1210_v53 }
 0x166   :  { %v250_v6 = vpop.f32.mrf.mxu0 }
 0x168   :  { %v252_v11 = vpop.f32.mrf.mxu0 }
 0x16d   :  { %v412_v20 = vpop.f32.mrf.mxu1 }
 0x16e   :  { %v413_v39 = vadd.f32 %v412_v20, %v250_v6 }
 0x16f   :  { %v414_v37 = vpop.f32.mrf.mxu1 }
 0x170   :  { %v415_v58 = vadd.f32 %v414_v37, %v252_v11 }
 0x178   :  { %v521_v27 = vpop.f32.mrf.mxu0 }
 0x179   :  { %v522_v59 = vadd.f32 %v521_v27, %v413_v39 }
 0x17a   :  { %v523_v2 = vpop.f32.mrf.mxu0 }
 0x17b   :  { %v524_v16 = vadd.f32 %v523_v2, %v415_v58 }
 0x181   :  { %v613_v38 = vpop.f32.mrf.mxu1 }
 0x182   :  { %v614_v32 = vadd.f32 %v613_v38, %v522_v59 }
 0x183   :  { %v615_v15 = vpop.f32.mrf.mxu1 }
 0x184   :  { %v616_v35 = vadd.f32 %v615_v15, %v524_v16 }
 0x18c   :  { %v739_v40 = vpop.f32.mrf.mxu0 }
 0x18d   :  { %v740_v55 = vadd.f32 %v739_v40, %v614_v32 }
 0x18e   :  { %v741_v34 = vpop.f32.mrf.mxu0 }
 0x18f   :  { %v742_v21 = vadd.f32 %v741_v34, %v616_v35 }
 0x194   :  { %v829_v53 = vpop.f32.mrf.mxu1 }
 0x195   :  { %v1543_v23 = vadd.f32 %v829_v53, %v740_v55 }
 0x196   :  { %v831_v41 = vpop.f32.mrf.mxu1 }
 0x197   :  { %v1546_v42 = vadd.f32 %v835_v60, %v1543_v23  ;;  %v840_v0 = vadd.f32 %v839_v10, %v1543_v23  ;;  %v1549_v29 = vadd.f32 %v831_v41, %v742_v21 }
 0x199   :  { %v1552_v28 = vadd.f32 %v835_v60, %v1549_v29  ;;  %v841_v36 = vadd.f32 %v839_v10, %v1549_v29  ;;  %v866_v31 = vmul.f32 0.8824969, %v1546_v42  ;;  %v848_v51 = vmul.f32 -0.6861428, %v840_v0 }
 0x19a   :  { %v878_v30 = vmul.f32 0.6861428, %v840_v0  ;;  %v846_v9 = vmul.f32 0.3684273, %v1546_v42  ;;  %v900_v3 = vmul.f32 -0.7775017, %v840_v0 }
 0x19b   :  { %v867_v26 = vmul.f32 0.8824969, %v1552_v28  ;;  %868 = vrot.lane.b32.xlu0 %v866_v31, %s1025_s25  ;;  %v849_v19 = vmul.f32 -0.6861428, %v841_v36  ;;  %v852_v50 = vrot.slane %v848_v51, 2 }
 0x19c   :  { %v879_v52 = vmul.f32 0.6861428, %v841_v36  ;;  %v847_v24 = vmul.f32 0.3684273, %v1552_v28  ;;  %v882_v45 = vrot.slane %v878_v30, 2  ;;  %v904_v48 = vrot.slane %v900_v3, 2 }
 0x19d   :  { %870 = vrot.lane.b32.xlu1 %v867_v26, %s1025_s25  ;;  %v853_v61 = vrot.slane %v849_v19, 2  ;;  %v856_v5 = vadd.f32 %v852_v50, %v846_v9  ;;  %v901_v54 = vmul.f32 -0.7775017, %v841_v36  ;;  %v922_v49 = vmul.f32 0.7775017, %v840_v0 }
 0x19e   :  { %v883_v63 = vrot.slane %v879_v52, 2  ;;  %v886_v33 = vadd.f32 %v882_v45, %v846_v9  ;;  %v923_v56 = vmul.f32 0.7775017, %v841_v36  ;;  %v898_v57 = vmul.f32 0.41748285, %v1546_v42 }
 0x19f   :  { %952 = vrot.lane.b32.xlu0 %v866_v31, %s1018_s19  ;;  %v857_v1 = vadd.f32 %v853_v61, %v847_v24  ;;  %v905_v47 = vrot.slane %v901_v54, 2  ;;  %v899_v62 = vmul.f32 0.41748285, %v1552_v28  ;;  %v926_v8 = vrot.slane %v922_v49, 2 }
 0x1a0   :  { %v887_v46 = vadd.f32 %v883_v63, %v847_v24  ;;  %v908_v7 = vadd.f32 %v904_v48, %v898_v57  ;;  %v927_v6 = vrot.slane %v923_v56, 2  ;;  %v843_v49 = vstv %s992_s30 }
 0x1a1   :  { %954 = vrot.lane.b32.xlu1 %v867_v26, %s1018_s19  ;;  %v909_v12 = vadd.f32 %v905_v47, %v899_v62  ;;  %v930_v11 = vadd.f32 %v926_v8, %v898_v57 }
 0x1a2   :  { %v931_v20 = vadd.f32 %v927_v6, %v899_v62  ;;  %v845_v6 = vadd.f32 %v843_v49, %v1549_v29 }
 0x1a3   :  { %858 = vrot.lane.b32.xlu0 %v856_v5, %s1026_s26 }
 0x1a5   :  { %860 = vrot.lane.b32.xlu1 %v857_v1, %s1026_s26 }
 0x1a7   :  { %888 = vrot.lane.b32.xlu0 %v886_v33, %s1023_s0 }
 0x1a9   :  { %890 = vrot.lane.b32.xlu1 %v887_v46, %s1023_s0 }
 0x1ab   :  { %910 = vrot.lane.b32.xlu0 %v908_v7, %s1022_s24 }
 0x1ad   :  { %912 = vrot.lane.b32.xlu1 %v909_v12, %s1022_s24  ;;  %v844_v12 = vadd.f32 %v843_v49, %v1543_v23 }
 0x1af   :  { %932 = vrot.lane.b32.xlu0 %v930_v11, %s1021_s23 }
 0x1b1   :  { %934 = vrot.lane.b32.xlu1 %v931_v20, %s1021_s23 }
 0x1b3   :  { %942 = vrot.lane.b32.xlu0 %v856_v5, %s1020_s22 }
 0x1b5   :  { %944 = vrot.lane.b32.xlu1 %v857_v1, %s1020_s22 }
 0x1b7   :  { %962 = vrot.lane.b32.xlu0 %v886_v33, %s1019_s2 }
 0x1b9   :  { %964 = vrot.lane.b32.xlu1 %v887_v46, %s1019_s2 }
 0x20d   :  { %v869_v27 = vpop.permute.xlu0 %868 }
 0x20f   :  { %v871_v37 = vpop.permute.xlu1 %870 }
 0x210   :  { %v872_v15 = vsel %vm69_vm7, %v869_v27, %v871_v37  ;;  %v873_v16 = vsel %vm69_vm7, %v871_v37, %v869_v27  ;;  %vm1724_vm7 = vcmp.lt.s32.totalorder %v1074_v4, 112 }
 0x211   :  { %v953_v2 = vpop.permute.xlu0 %952  ;;  %v874_v10 = vsel %vm1176_vm4, %v873_v16, 0.0  ;;  %v875_v21 = vsel %vm1180_vm8, %v872_v15, 0.0  ;;  %vm1725_vm8 = vmmov %vm1724_vm7 }
 0x212   :  { %vm1732_vm4 = vmand %vm1086_vm0, %vm1090_vm1 }
 0x213   :  { %v955_v38 = vpop.permute.xlu1 %954 }
 0x214   :  { %v956_v46 = vsel %vm1724_vm7, %v953_v2, %v955_v38 }
 0x215   :  { %v859_v39 = vpop.permute.xlu0 %858  ;;  %v958_v27 = vsel %vm1086_vm0, %v956_v46, 0.0 }
 0x217   :  { %v861_v40 = vpop.permute.xlu1 %860 }
 0x218   :  { %v862_v58 = vsel %vm56_vm10, %v859_v39, %v861_v40  ;;  %v863_v59 = vsel %vm56_vm10, %v861_v40, %v859_v39  ;;  %vm1726_vm10 = vcmp.lt.s32.totalorder %v1074_v4, 113 }
 0x219   :  { %v889_v32 = vpop.permute.xlu0 %888  ;;  %v864_v34 = vsel %vm40_vm5, %v863_v59, 0.0  ;;  %v865_v35 = vsel %vm41_vm11, %v862_v58, 0.0  ;;  %vm1722_vm5 = vcmp.lt.s32.totalorder %v1074_v4, 127  ;;  %vm1727_vm11 = vmmov %vm1726_vm10  ;;  %v974_v58 = vrot.slane %v844_v12, 2 }
 0x21a   :  { %v876_v36 = vadd.f32 %v874_v10, %v864_v34  ;;  %v877_v31 = vadd.f32 %v875_v21, %v865_v35  ;;  %v975_v59 = vrot.slane %v845_v6, 2 }
 0x21b   :  { %v891_v55 = vpop.permute.xlu1 %890 }
 0x21c   :  { %v892_v53 = vsel %vm82_vm6, %v889_v32, %v891_v55  ;;  %v893_v60 = vsel %vm82_vm6, %v891_v55, %v889_v32  ;;  %vm1723_vm6 = vmmov %vm1722_vm5 }
 0x21d   :  { %v894_v41 = vsel %vm44_vm14, %v893_v60, 0.0  ;;  %v895_v0 = vsel %vm45_vm13, %v892_v53, 0.0  ;;  %v911_v51 = vpop.permute.xlu0 %910  ;;  %vm1728_vm13 = vmand %vm1086_vm0, %vm1119_vm9 }
 0x21e   :  { %v896_v19 = vadd.f32 %v894_v41, %v876_v36  ;;  %v897_v50 = vadd.f32 %v895_v0, %v877_v31  ;;  %vm1729_vm14 = vmand %vm1094_vm2, %vm1125_vm12 }
 0x21f   :  { %v913_v26 = vpop.permute.xlu1 %912 }
 0x220   :  { %v914_v43 = vsel %vm95_vm15, %v911_v51, %v913_v26  ;;  %v915_v30 = vsel %vm95_vm15, %v913_v26, %v911_v51  ;;  %vm978_vm15 = vcmask 1041408  }
 0x221   :  { %v916_v44 = vsel %vm1119_vm9, %v915_v30, 0.0  ;;  %v917_v61 = vsel %vm1125_vm12, %v914_v43, 0.0  ;;  %v933_v24 = vpop.permute.xlu0 %932  ;;  %vm1730_vm9 = vcmp.lt.s32.totalorder %v1074_v4, 111 }
 0x222   :  { %v918_v52 = vadd.f32 %v916_v44, %v896_v19  ;;  %v919_v9 = vadd.f32 %v917_v61, %v897_v50  ;;  %vm1731_vm12 = vmmov %vm1730_vm9 }
 0x223   :  { %v935_v5 = vpop.permute.xlu1 %934 }
 0x224   :  { %v920_v45 = vadd.f32 %v918_v52, %v1546_v42  ;;  %v921_v3 = vadd.f32 %v919_v9, %v1552_v28  ;;  %v936_v1 = vsel %vm1722_vm5, %v933_v24, %v935_v5  ;;  %v937_v63 = vsel %vm1723_vm6, %v935_v5, %v933_v24  ;;  %vm1733_vm5 = vmand %vm1094_vm2, %vm1098_vm3 }
 0x225   :  { %v938_v54 = vsel %vm1090_vm1, %v936_v1, 0.0  ;;  %v939_v33 = vsel %vm1098_vm3, %v937_v63, 0.0  ;;  %v943_v48 = vpop.permute.xlu0 %942  ;;  %v957_v42 = vsel %vm1725_vm8, %v955_v38, %v953_v2 }
 0x226   :  { %v940_v47 = vadd.f32 %v938_v54, %v920_v45  ;;  %v941_v56 = vadd.f32 %v939_v33, %v921_v3  ;;  %v959_v22 = vsel %vm1094_vm2, %v957_v42, 0.0 }
 0x227   :  { %v945_v28 = vpop.permute.xlu1 %944 }
 0x228   :  { %v946_v57 = vsel %vm1726_vm10, %v943_v48, %v945_v28  ;;  %v947_v62 = vsel %vm1727_vm11, %v945_v28, %v943_v48 }
 0x229   :  { %v948_v7 = vsel %vm1728_vm13, %v946_v57, 0.0  ;;  %v949_v8 = vsel %vm1729_vm14, %v947_v62, 0.0  ;;  %v963_v37 = vpop.permute.xlu0 %962 }
 0x22a   :  { %v950_v11 = vadd.f32 %v948_v7, %v940_v47  ;;  %v951_v20 = vadd.f32 %v949_v8, %v941_v56 }
 0x22b   :  { %v965_v2 = vpop.permute.xlu1 %964 }
 0x22c   :  { %v960_v38 = vadd.f32 %v958_v27, %v950_v11  ;;  %v961_v39 = vadd.f32 %v959_v22, %v951_v20  ;;  %v966_v25 = vsel %vm1730_vm9, %v963_v37, %v965_v2  ;;  %v967_v23 = vsel %vm1731_vm12, %v965_v2, %v963_v37 }
 0x22d   :  { %v968_v29 = vsel %vm1732_vm4, %v966_v25, 0.0  ;;  %v969_v40 = vsel %vm1733_vm5, %v967_v23, 0.0 }
 0x22e   :  { %v970_v15 = vadd.f32 %v968_v29, %v960_v38  ;;  %v971_v16 = vadd.f32 %v969_v40, %v961_v39 }
 0x230   :  { %v979_v32 = vsel %vm978_vm15, %v970_v15, %v974_v58  ;;  %v980_v4 = vsel %vm978_vm15, %v971_v16, %v975_v59 }
 0x231   :  { %v983_v34 = vcombine.low %v979_v32, %v980_v4 }
 0x233   :  { %985 = vst [vmem:[%s1675_s3] sm:$0xff] %v983_v34 }
 0x234   :  { %990 = vsyncpa [#allocation3], 1 }

</bundles_post_ra>
